<compile_context>
chip_gen: v7x
topology: tpu7x:2x2x1
jax: 0.10.0
libtpu: 0.0.40
codegen_flags: <defaults>
</compile_context>

<pallas_src>
import functools

import jax
import jax.numpy as jnp
from jax.experimental import pallas as pl
from jax.experimental.pallas import tpu as pltpu


# ----------------------------------------------------------------------------
# small helpers
# ----------------------------------------------------------------------------
def _pick_tile(total, cap, mult):
    """Largest divisor of `total` that is a multiple of `mult` and <= `cap`.

    Falls back to `total` (a full-extent block is always legal; for awkward,
    indivisible extents it may use more VMEM than intended)."""
    if total <= cap:
        return total
    d = (cap // mult) * mult
    while d >= mult:
        if total % d == 0:
            return d
        d -= mult
    return total


def _device_kind():
    try:
        return jax.devices()[0].device_kind.lower()
    except Exception:
        return ""


def _vmem_limit_bytes():
    # v6e: 128 MiB physical -> 64 MiB scoped is comfortable.
    # v5e (16 MiB scoped default) / v7x (64 MiB physical): 48 MiB with headroom.
    return (64 if "v6" in _device_kind() else 48) * 1024 * 1024


def _kernel1_row_tile(tc, hw, c8):
    # x-block budget: ~8 MB on v6e, ~4 MB on v5e / v7x (per the review).
    budget = (8 if "v6" in _device_kind() else 4) * 1024 * 1024
    # residents that do NOT scale with tk: the (hw, 9) mask lane-padded to 128
    # (double-buffered), the bg accumulator, bias / window-sum blocks.
    fixed = 2 * hw * 128 * 4 + c8 * hw * 4 + 128 * 1024
    avail = max(budget - fixed, 1024 * 1024)
    # per-row bytes, double-buffered: x tile + w_eff tile + lane-padded px tile
    per_row = 2 * (hw * 4 + c8 * 4 + 128 * 4)
    cap = max(128, (avail // per_row) // 128 * 128)
    return _pick_tile(tc, cap, 128)


def _scale_block_budget():
    return (4 if "v6" in _device_kind() else 2) * 1024 * 1024


# ----------------------------------------------------------------------------
# Kernel 1: one streaming pass over x in its native layout.
#   rows = (frame, channel) on sublanes, hw on lanes.
# Per grid step (b, k):
#   * px:  per-row HW means (pooled scene path), written every step,
#   * bg accumulator (VMEM scratch): bias + w_eff_tile @ x_tile,
#   * epilogue (last k): 9 masked HW window sums of the temporal background
#     (the pooled 3x3 spatial conv is finished on the host; bg never hits HBM).
# Grid: (batch [parallel], K tiles over the T*c contraction [arbitrary]).
# ----------------------------------------------------------------------------
def _x_pass_kernel(x_ref, w_ref, bt_ref, m_ref, win_ref, px_ref, bg_acc):
    k = pl.program_id(1)
    x_blk = x_ref[0].astype(jnp.float32)                     # (tk, hw)
    inv_hw = 1.0 / x_ref.shape[2]

    # per-(frame, channel) spatial means for the pooled scene path
    px_ref[0] = jnp.sum(x_blk, axis=1, keepdims=True) * inv_hw

    @pl.when(k == 0)
    def _():
        # initialise the accumulator with the temporal-conv bias
        bg_acc[...] = jnp.broadcast_to(bt_ref[...], bg_acc.shape)

    bg_acc[...] += jnp.dot(w_ref[...], x_blk, preferred_element_type=jnp.float32)

    @pl.when(k == pl.num_programs(1) - 1)
    def _():
        # 9 masked HW-window sums of the (bias-included) temporal background;
        # the tiny (c8 x 9*c8) spatial-conv contraction is finished in XLA.
        win_ref[0] = jnp.dot(bg_acc[...], m_ref[...],
                             preferred_element_type=jnp.float32)


def x_pass_pallas(x_rows, w_eff, b_t, mask_t, *, vmem_limit):
    n, tc, hw = x_rows.shape
    c8 = w_eff.shape[0]
    tk = _kernel1_row_tile(tc, hw, c8)
    return pl.pallas_call(
        _x_pass_kernel,
        out_shape=(jax.ShapeDtypeStruct((n, c8, 9), jnp.float32),
                   jax.ShapeDtypeStruct((n, tc, 1), jnp.float32)),
        grid_spec=pltpu.PrefetchScalarGridSpec(
            num_scalar_prefetch=0,
            grid=(n, tc // tk),
            in_specs=[
                pl.BlockSpec((1, tk, hw), lambda b, k: (b, k, 0)),
                pl.BlockSpec((c8, tk), lambda b, k: (0, k)),
                pl.BlockSpec((c8, 1), lambda b, k: (0, 0)),
                pl.BlockSpec((hw, 9), lambda b, k: (0, 0)),
            ],
            out_specs=(
                pl.BlockSpec((1, c8, 9), lambda b, k: (b, 0, 0)),
                pl.BlockSpec((1, tk, 1), lambda b, k: (b, k, 0)),
            ),
            scratch_shapes=[pltpu.VMEM((c8, hw), jnp.float32)],
        ),
        compiler_params=pltpu.CompilerParams(
            dimension_semantics=("parallel", "arbitrary"),
            vmem_limit_bytes=vmem_limit),
    )(x_rows, w_eff, b_t, mask_t)


# ----------------------------------------------------------------------------
# Kernel 2a: lane-dense broadcast multiply for hw % 128 != 0.
# x viewed as (nt, c*hw); the per-(frame, channel) attention scalars are
# expanded to (tb, tchw) in-kernel via one small MXU matmul against a 0/1
# expansion matrix (exact: each output is a single attention value), so the
# output block's last dim is a large multiple of 128 -> unmasked stores, and
# no in-kernel reshapes of the big tile.
# ----------------------------------------------------------------------------
def _scale_dense_kernel(x_ref, a_ref, e_ref, o_ref):
    scale = jnp.dot(a_ref[...], e_ref[...], preferred_element_type=jnp.float32)
    o_ref[...] = (x_ref[...].astype(jnp.float32) * scale).astype(o_ref.dtype)


def scale_dense_pallas(x2, att, expand, *, vmem_limit):
    nt, chw = x2.shape
    c = att.shape[1]
    blk = _scale_block_budget()
    # keep the expansion block modest in VMEM and lanes a big multiple of 128
    col_cap = max(128, min(16384, (2 * 1024 * 1024) // max(1, 4 * c)) // 128 * 128)
    tchw = _pick_tile(chw, col_cap, 128)
    row_cap = max(8, (blk // max(1, tchw * 4)) // 8 * 8)
    tb = _pick_tile(nt, row_cap, 8)
    # give both v7x TensorCores work when the natural grid is a single step
    if (nt // tb) * (chw // tchw) < 2 and chw % 256 == 0 and chw >= 256:
        tchw = chw // 2
    return pl.pallas_call(
        _scale_dense_kernel,
        out_shape=jax.ShapeDtypeStruct((nt, chw), x2.dtype),
        grid_spec=pltpu.PrefetchScalarGridSpec(
            num_scalar_prefetch=0,
            # columns outer so the expansion block is only re-fetched per column
            grid=(chw // tchw, nt // tb),
            in_specs=[
                pl.BlockSpec((tb, tchw), lambda j, i: (i, j)),
                pl.BlockSpec((tb, c), lambda j, i: (i, 0)),
                pl.BlockSpec((c, tchw), lambda j, i: (0, j)),
            ],
            out_specs=pl.BlockSpec((tb, tchw), lambda j, i: (i, j)),
        ),
        compiler_params=pltpu.CompilerParams(
            dimension_semantics=("parallel", "parallel"),
            vmem_limit_bytes=vmem_limit),
    )(x2, att, expand)


# ----------------------------------------------------------------------------
# Kernel 2b: per-row scale (used when hw % 128 == 0 -- already lane-dense --
# or as a fallback when the expansion matrix would be too large).
# ----------------------------------------------------------------------------
def _scale_rows_kernel(x_ref, a_ref, o_ref):
    o_ref[...] = (x_ref[...].astype(jnp.float32) * a_ref[...]).astype(o_ref.dtype)


def scale_rows_pallas(x_flat, a_col, *, vmem_limit):
    m, hw = x_flat.shape
    blk = _scale_block_budget()
    # per-row bytes, double-buffered: x in + out + lane-padded (tr, 1) scalars
    per_row = 2 * (2 * hw * 4 + 128 * 4)
    cap = max(8, blk // per_row)
    if m >= 16:
        cap = min(cap, m // 2)     # >= 2 grid steps for v7x megacore
    cap = max(8, (cap // 8) * 8)
    tr = _pick_tile(m, cap, 8)
    return pl.pallas_call(
        _scale_rows_kernel,
        out_shape=jax.ShapeDtypeStruct((m, hw), x_flat.dtype),
        grid_spec=pltpu.PrefetchScalarGridSpec(
            num_scalar_prefetch=0,
            grid=(m // tr,),
            in_specs=[
                pl.BlockSpec((tr, hw), lambda i: (i, 0)),
                pl.BlockSpec((tr, 1), lambda i: (i, 0)),
            ],
            out_specs=pl.BlockSpec((tr, hw), lambda i: (i, 0)),
        ),
        compiler_params=pltpu.CompilerParams(
            dimension_semantics=("parallel",),
            vmem_limit_bytes=vmem_limit),
    )(x_flat, a_col)


# ----------------------------------------------------------------------------
# FE forward: 2 pallas_calls over x + a few KB of pooled math in XLA.
# ----------------------------------------------------------------------------
def fe_forward(x, params, n_segment):
    nt, c, h, wd = x.shape
    t_seg = n_segment
    n = nt // t_seg
    hw = h * wd
    c8 = params["w_scene"].shape[0]
    tc = t_seg * c
    f32 = jnp.float32
    vlim = _vmem_limit_bytes()

    # -------- weight / constant preparation (tiny arrays, host) --------
    w_sc = params["w_scene"].reshape(c8, c).astype(f32)
    b_sc = params["b_scene"].astype(f32)

    # temporal (3,1,1) conv + mean over T folded into one effective weight:
    # frame t contributes W1 + [t<T-1]*W0 + [t>=1]*W2, all divided by T.
    w_t = params["w_bgT"].reshape(c8, c, 3).astype(f32)
    t_idx = jnp.arange(t_seg)
    gate0 = (t_idx < t_seg - 1).astype(f32)
    gate2 = (t_idx >= 1).astype(f32)
    w_eff = (w_t[:, :, 1:2]
             + w_t[:, :, 0:1] * gate0[None, None, :]
             + w_t[:, :, 2:3] * gate2[None, None, :])          # (c8, c, T)
    w_eff = (w_eff * (1.0 / t_seg)).reshape(c8, tc)            # col p = ci*T + t
    b_t = params["b_bgT"].reshape(c8, 1).astype(f32)

    # 3x3 spatial conv in pooled form: per-tap window masks over hw
    ws_flat = params["w_bgS"].reshape(c8, c8 * 9).astype(f32)  # col = i*9 + tap
    b_s = params["b_bgS"].astype(f32)
    ys = jnp.arange(hw) // wd
    xs = jnp.arange(hw) % wd
    row_ok = [ys <= h - 2, jnp.full((hw,), True), ys >= 1]     # ky = 0,1,2
    col_ok = [xs <= wd - 2, jnp.full((hw,), True), xs >= 1]    # kx = 0,1,2
    mask_t = jnp.stack([(row_ok[ky] & col_ok[kx]).astype(f32)
                        for ky in range(3) for kx in range(3)], axis=1)  # (hw,9)

    w_att = params["w_att"].reshape(c, c8).astype(f32)
    b_att = params["b_att"].astype(f32)

    # -------- kernel 1: single streaming pass over x --------
    # torch's x.view(n, c, T, h, w) flattened over (c, T) is exactly the native
    # (frame, channel) row order of x, so x is only reshaped, never transposed.
    x_rows = x.reshape(n, tc, hw)
    win, px = x_pass_pallas(x_rows, w_eff, b_t, mask_t, vmem_limit=vlim)
    # win: (n, c8, 9) masked window sums     px: (n, tc, 1) per-row HW means

    # -------- pooled math in plain XLA (a few KB) --------
    pbg = (win.reshape(n, c8 * 9) @ ws_flat.T) * (1.0 / hw) + b_s[None, :]  # (n,c8)
    px3 = px.reshape(n, c, t_seg)                              # == HW-mean of x_3d
    pscene = jnp.einsum('oc,nct->not', w_sc, px3) + b_sc[None, :, None]     # (n,c8,T)

    # exact torch `.repeat((T,1,1,1,1)).view(n,-1,T,h,w)` and `.view((nt,-1,h,w))`
    # semantics applied to the pooled tensors (the reinterpretation never touches
    # H, W, so it commutes with the average pool).  Note the scramble mixes batch
    # elements, which is why a single fully-fused pass over x is not possible.
    scene_rows = pscene.reshape(nt, c8)
    bg_rows = jnp.tile(pbg.reshape(n * c8), (t_seg,)).reshape(nt, c8)
    att = (scene_rows - bg_rows) @ w_att.T + b_att[None, :]                 # (nt,c)

    # -------- kernel 2: x * att (lane-dense) --------
    chw = c * hw
    if hw % 128 == 0:
        out = scale_rows_pallas(x.reshape(nt * c, hw), att.reshape(nt * c, 1),
                                vmem_limit=vlim)
    elif c * chw * 4 <= 8 * 1024 * 1024:
        expand = jnp.repeat(jnp.eye(c, dtype=f32), hw, axis=1)      # (c, c*hw) 0/1
        out = scale_dense_pallas(x.reshape(nt, chw), att, expand, vmem_limit=vlim)
    else:
        # Fallback for very large c * hw with hw not lane-aligned: per-row form
        # (masked stores accepted; expansion matrix would be too large).
        out = scale_rows_pallas(x.reshape(nt * c, hw), att.reshape(nt * c, 1),
                                vmem_limit=vlim)
    return out.reshape(nt, c, h, wd)


# ----------------------------------------------------------------------------
# Pure-JAX reference that mirrors the PyTorch forward literally (self-check).
# ----------------------------------------------------------------------------
def fe_reference(x, params, n_segment):
    nt, c, h, wd = x.shape
    t_seg = n_segment
    n = nt // t_seg
    c8 = params["w_scene"].shape[0]

    x3d = x.reshape(n, c, t_seg, h, wd)

    w_sc = params["w_scene"].reshape(c8, c)
    scene = (jnp.einsum('oc,ncdyx->nodyx', w_sc, x3d)
             + params["b_scene"][None, :, None, None, None])

    w_t = params["w_bgT"].reshape(c8, c, 3)
    xpad = jnp.pad(x3d, ((0, 0), (0, 0), (1, 1), (0, 0), (0, 0)))
    bg = sum(jnp.einsum('oc,ncdyx->nodyx', w_t[:, :, k], xpad[:, :, k:k + t_seg])
             for k in range(3))
    bg = bg.mean(axis=2) + params["b_bgT"][None, :, None, None]        # (n,c8,h,w)

    w_s = params["w_bgS"]
    bgp = jnp.pad(bg, ((0, 0), (0, 0), (1, 1), (1, 1)))
    bg = sum(jnp.einsum('oi,niyx->noyx', w_s[:, :, ky, kx],
                        bgp[:, :, ky:ky + h, kx:kx + wd])
             for ky in range(3) for kx in range(3))
    bg = bg + params["b_bgS"][None, :, None, None]

    bg_rep = jnp.broadcast_to(bg[None], (t_seg, n, c8, h, wd)).reshape(
        n, c8, t_seg, h, wd)
    fg = (scene - bg_rep).reshape(nt, c8, h, wd)
    pooled = fg.mean(axis=(2, 3))                                       # (nt, c8)

    w_att = params["w_att"].reshape(c, c8)
    att = pooled @ w_att.T + params["b_att"][None, :]                   # (nt, c)
    return x * att[:, :, None, None]


# ----------------------------------------------------------------------------
# Deterministic parameter init (shapes follow FE.__init__; values synthetic)
# ----------------------------------------------------------------------------
def init_params(key, c, n_div=8):
    c8 = c // n_div
    ks = jax.random.split(key, 8)

    def u(k, shape, fan_in):
        bound = 1.0 / jnp.sqrt(jnp.float32(fan_in))
        return jax.random.uniform(k, shape, jnp.float32, -bound, bound)

    return {
        "w_scene": u(ks[0], (c8, c, 1, 1, 1), c),        # Conv3d (1,1,1)
        "b_scene": u(ks[1], (c8,), c),
        "w_bgT": u(ks[2], (c8, c, 3, 1, 1), 3 * c),      # Conv3d (3,1,1)
        "b_bgT": u(ks[3], (c8,), 3 * c),
        "w_bgS": u(ks[4], (c8, c8, 3, 3), 9 * c8),       # Conv2d 3x3
        "b_bgS": u(ks[5], (c8,), 9 * c8),
        "w_att": u(ks[6], (c, c8, 1, 1), c8),            # Conv2d 1x1
        "b_att": u(ks[7], (c,), c8),
    }


if __name__ == "__main__":
    key = jax.random.PRNGKey(0)
    k_x, k_p = jax.random.split(key)

    n_segment = 4
    n_batch = 2
    c = 32          # in_channels (must be divisible by n_div=8)
    h = w = 8
    nt = n_batch * n_segment

    x = jax.random.normal(k_x, (nt, c, h, w), jnp.float32)
    params = init_params(k_p, c, n_div=8)

    fe = jax.jit(functools.partial(fe_forward, n_segment=n_segment))
    out = fe(x, params)
    jax.block_until_ready(out)

    assert out.shape == (nt, c, h, w)
    assert out.dtype == jnp.float32

    ref = jax.jit(functools.partial(fe_reference, n_segment=n_segment))(x, params)
    jax.block_until_ready(ref)
    max_err = float(jnp.max(jnp.abs(out - ref)))
    assert max_err < 5e-2, f"mismatch vs reference: max abs err = {max_err}"

    print("KERNEL_OK")
</pallas_src>

<mosaic_0001>
module attributes {stable_mosaic.version = 11 : i64} {
  func.func @_x_pass_kernel(%arg0: i32, %arg1: i32, %arg2: memref<1x128x64xf32, #tpu.memory_space<vmem>>, %arg3: memref<4x128xf32, #tpu.memory_space<vmem>>, %arg4: memref<4x1xf32, #tpu.memory_space<vmem>>, %arg5: memref<64x9xf32, #tpu.memory_space<vmem>>, %arg6: memref<1x4x9xf32, #tpu.memory_space<vmem>>, %arg7: memref<1x128x1xf32, #tpu.memory_space<vmem>>, %arg8: memref<4x64xf32, #tpu.memory_space<vmem>>) attributes {dimension_semantics = [#tpu.dimension_semantics<parallel>, #tpu.dimension_semantics<arbitrary>], iteration_bounds = array<i64: 2, 1>, scalar_prefetch = 0 : i64, scratch_operands = 1 : i64, tpu.core_type = #tpu.core_type<tc>, window_params = [{transform_indices = @transform_0, window_bounds = array<i64: 1, 128, 64>}, {transform_indices = @transform_1, window_bounds = array<i64: 4, 128>}, {pipeline_mode = #tpu.pipeline_mode<synchronous>, transform_indices = @transform_2, window_bounds = array<i64: 4, 1>}, {pipeline_mode = #tpu.pipeline_mode<synchronous>, transform_indices = @transform_3, window_bounds = array<i64: 64, 9>}, {transform_indices = @transform_4, window_bounds = array<i64: 1, 4, 9>}, {transform_indices = @transform_5, window_bounds = array<i64: 1, 128, 1>}]} {
    %c0 = arith.constant 0 : index
    %c0_0 = arith.constant 0 : index
    %c0_1 = arith.constant 0 : index
    %0 = vector.load %arg2[%c0, %c0_0, %c0_1] : memref<1x128x64xf32, #tpu.memory_space<vmem>>, vector<1x128x64xf32>
    %1 = vector.shape_cast %0 : vector<1x128x64xf32> to vector<128x64xf32>
    %cst = arith.constant dense<0.000000e+00> : vector<128xf32>
    %2 = vector.multi_reduction <add>, %1, %cst [1] : vector<128x64xf32> to vector<128xf32>
    %3 = vector.shape_cast %2 : vector<128xf32> to vector<128x1xf32>
    %cst_2 = arith.constant 1.562500e-02 : f32
    %4 = vector.broadcast %cst_2 : f32 to vector<128x1xf32>
    %5 = arith.mulf %3, %4 : vector<128x1xf32>
    %c0_3 = arith.constant 0 : index
    %c0_4 = arith.constant 0 : index
    %c0_5 = arith.constant 0 : index
    %6 = vector.load %arg7[%c0_3, %c0_4, %c0_5] : memref<1x128x1xf32, #tpu.memory_space<vmem>>, vector<1x128x1xf32>
    %7 = vector.shape_cast %6 : vector<1x128x1xf32> to vector<128x1xf32>
    %8 = vector.shape_cast %5 : vector<128x1xf32> to vector<1x128x1xf32>
    tpu.vector_store %arg7[%c0_3, %c0_4, %c0_5], %8 {strides = array<i32>} : memref<1x128x1xf32, #tpu.memory_space<vmem>>, vector<1x128x1xf32>,
    %c0_i32 = arith.constant 0 : i32
    %9 = arith.cmpi eq, %arg1, %c0_i32 : i32
    %10 = arith.extui %9 : i1 to i32
    %c0_i32_6 = arith.constant 0 : i32
    %11 = arith.cmpi ne, %10, %c0_i32_6 : i32
    scf.if %11 {
      %c0_16 = arith.constant 0 : index
      %c0_17 = arith.constant 0 : index
      %20 = vector.load %arg4[%c0_16, %c0_17] : memref<4x1xf32, #tpu.memory_space<vmem>>, vector<4x1xf32>
      %21 = vector.shape_cast %20 : vector<4x1xf32> to vector<4x1xf32>
      %22 = vector.broadcast %21 : vector<4x1xf32> to vector<4x64xf32>
      %c0_18 = arith.constant 0 : index
      %c0_19 = arith.constant 0 : index
      %23 = vector.load %arg8[%c0_18, %c0_19] : memref<4x64xf32, #tpu.memory_space<vmem>>, vector<4x64xf32>
      tpu.vector_store %arg8[%c0_18, %c0_19], %22 {strides = array<i32>} : memref<4x64xf32, #tpu.memory_space<vmem>>, vector<4x64xf32>,
    } else {
    }
    %c0_7 = arith.constant 0 : index
    %c0_8 = arith.constant 0 : index
    %12 = vector.load %arg8[%c0_7, %c0_8] : memref<4x64xf32, #tpu.memory_space<vmem>>, vector<4x64xf32>
    %c0_9 = arith.constant 0 : index
    %c0_10 = arith.constant 0 : index
    %13 = vector.load %arg3[%c0_9, %c0_10] : memref<4x128xf32, #tpu.memory_space<vmem>>, vector<4x128xf32>
    %cst_11 = arith.constant dense<0.000000e+00> : vector<4x64xf32>
    %14 = tpu.matmul %13, %1, %cst_11 {dimension_numbers = #tpu.dot_dimension_numbers<[1], [0], [0], [1], [0, 0, 1, 1], [], []>} : vector<4x128xf32>, vector<128x64xf32>, vector<4x64xf32> -> vector<4x64xf32>
    %15 = arith.addf %12, %14 : vector<4x64xf32>
    %c0_12 = arith.constant 0 : index
    %c0_13 = arith.constant 0 : index
    %16 = vector.load %arg8[%c0_12, %c0_13] : memref<4x64xf32, #tpu.memory_space<vmem>>, vector<4x64xf32>
    tpu.vector_store %arg8[%c0_12, %c0_13], %15 {strides = array<i32>} : memref<4x64xf32, #tpu.memory_space<vmem>>, vector<4x64xf32>,
    %c0_i32_14 = arith.constant 0 : i32
    %17 = arith.cmpi eq, %arg1, %c0_i32_14 : i32
    %18 = arith.extui %17 : i1 to i32
    %c0_i32_15 = arith.constant 0 : i32
    %19 = arith.cmpi ne, %18, %c0_i32_15 : i32
    scf.if %19 {
      %c0_16 = arith.constant 0 : index
      %c0_17 = arith.constant 0 : index
      %20 = vector.load %arg8[%c0_16, %c0_17] : memref<4x64xf32, #tpu.memory_space<vmem>>, vector<4x64xf32>
      %c0_18 = arith.constant 0 : index
      %c0_19 = arith.constant 0 : index
      %21 = vector.load %arg5[%c0_18, %c0_19] : memref<64x9xf32, #tpu.memory_space<vmem>>, vector<64x9xf32>
      %cst_20 = arith.constant dense<0.000000e+00> : vector<4x9xf32>
      %22 = tpu.matmul %20, %21, %cst_20 {dimension_numbers = #tpu.dot_dimension_numbers<[1], [0], [0], [1], [0, 0, 1, 1], [], []>} : vector<4x64xf32>, vector<64x9xf32>, vector<4x9xf32> -> vector<4x9xf32>
      %c0_21 = arith.constant 0 : index
      %c0_22 = arith.constant 0 : index
      %c0_23 = arith.constant 0 : index
      %23 = vector.load %arg6[%c0_21, %c0_22, %c0_23] : memref<1x4x9xf32, #tpu.memory_space<vmem>>, vector<1x4x9xf32>
      %24 = vector.shape_cast %23 : vector<1x4x9xf32> to vector<4x9xf32>
      %25 = vector.shape_cast %22 : vector<4x9xf32> to vector<1x4x9xf32>
      tpu.vector_store %arg6[%c0_21, %c0_22, %c0_23], %25 {strides = array<i32>} : memref<1x4x9xf32, #tpu.memory_space<vmem>>, vector<1x4x9xf32>,
    } else {
    }
    return
  }
  func.func @transform_0(%arg0: i32, %arg1: i32) -> (i32, i32, i32) {
    %c0_i32 = arith.constant 0 : i32
    %c0_i32_0 = arith.constant 0 : i32
    return %arg0, %arg1, %c0_i32 : i32, i32, i32
  }
  func.func @transform_1(%arg0: i32, %arg1: i32) -> (i32, i32) {
    %c0_i32 = arith.constant 0 : i32
    %c0_i32_0 = arith.constant 0 : i32
    return %c0_i32, %arg1 : i32, i32
  }
  func.func @transform_2(%arg0: i32, %arg1: i32) -> (i32, i32) {
    %c0_i32 = arith.constant 0 : i32
    %c0_i32_0 = arith.constant 0 : i32
    %c0_i32_1 = arith.constant 0 : i32
    return %c0_i32, %c0_i32_0 : i32, i32
  }
  func.func @transform_3(%arg0: i32, %arg1: i32) -> (i32, i32) {
    %c0_i32 = arith.constant 0 : i32
    %c0_i32_0 = arith.constant 0 : i32
    %c0_i32_1 = arith.constant 0 : i32
    return %c0_i32, %c0_i32_0 : i32, i32
  }
  func.func @transform_4(%arg0: i32, %arg1: i32) -> (i32, i32, i32) {
    %c0_i32 = arith.constant 0 : i32
    %c0_i32_0 = arith.constant 0 : i32
    %c0_i32_1 = arith.constant 0 : i32
    return %arg0, %c0_i32, %c0_i32_0 : i32, i32, i32
  }
  func.func @transform_5(%arg0: i32, %arg1: i32) -> (i32, i32, i32) {
    %c0_i32 = arith.constant 0 : i32
    %c0_i32_0 = arith.constant 0 : i32
    return %arg0, %arg1, %c0_i32 : i32, i32, i32
  }
}

module attributes {stable_mosaic.version = 11 : i64} {
  func.func @_scale_dense_kernel(%arg0: i32, %arg1: i32, %arg2: memref<8x1024xf32, #tpu.memory_space<vmem>>, %arg3: memref<8x32xf32, #tpu.memory_space<vmem>>, %arg4: memref<32x1024xf32, #tpu.memory_space<vmem>>, %arg5: memref<8x1024xf32, #tpu.memory_space<vmem>>) attributes {dimension_semantics = [#tpu.dimension_semantics<parallel>, #tpu.dimension_semantics<parallel>], iteration_bounds = array<i64: 2, 1>, scalar_prefetch = 0 : i64, scratch_operands = 0 : i64, tpu.core_type = #tpu.core_type<tc>, window_params = [{transform_indices = @transform_0, window_bounds = array<i64: 8, 1024>}, {transform_indices = @transform_1, window_bounds = array<i64: 8, 32>}, {transform_indices = @transform_2, window_bounds = array<i64: 32, 1024>}, {transform_indices = @transform_3, window_bounds = array<i64: 8, 1024>}]} {
    %c0 = arith.constant 0 : index
    %c0_0 = arith.constant 0 : index
    %0 = vector.load %arg3[%c0, %c0_0] : memref<8x32xf32, #tpu.memory_space<vmem>>, vector<8x32xf32>
    %c0_1 = arith.constant 0 : index
    %c0_2 = arith.constant 0 : index
    %1 = vector.load %arg4[%c0_1, %c0_2] : memref<32x1024xf32, #tpu.memory_space<vmem>>, vector<32x1024xf32>
    %cst = arith.constant dense<0.000000e+00> : vector<8x1024xf32>
    %2 = tpu.matmul %0, %1, %cst {dimension_numbers = #tpu.dot_dimension_numbers<[1], [0], [0], [1], [0, 0, 1, 1], [], []>} : vector<8x32xf32>, vector<32x1024xf32>, vector<8x1024xf32> -> vector<8x1024xf32>
    %c0_3 = arith.constant 0 : index
    %c0_4 = arith.constant 0 : index
    %3 = vector.load %arg2[%c0_3, %c0_4] : memref<8x1024xf32, #tpu.memory_space<vmem>>, vector<8x1024xf32>
    %4 = arith.mulf %3, %2 : vector<8x1024xf32>
    %c0_5 = arith.constant 0 : index
    %c0_6 = arith.constant 0 : index
    %5 = vector.load %arg5[%c0_5, %c0_6] : memref<8x1024xf32, #tpu.memory_space<vmem>>, vector<8x1024xf32>
    tpu.vector_store %arg5[%c0_5, %c0_6], %4 {strides = array<i32>} : memref<8x1024xf32, #tpu.memory_space<vmem>>, vector<8x1024xf32>,
    return
  }
  func.func @transform_0(%arg0: i32, %arg1: i32) -> (i32, i32) {
    %c0_i32 = arith.constant 0 : i32
    return %arg1, %arg0 : i32, i32
  }
  func.func @transform_1(%arg0: i32, %arg1: i32) -> (i32, i32) {
    %c0_i32 = arith.constant 0 : i32
    %c0_i32_0 = arith.constant 0 : i32
    return %arg1, %c0_i32 : i32, i32
  }
  func.func @transform_2(%arg0: i32, %arg1: i32) -> (i32, i32) {
    %c0_i32 = arith.constant 0 : i32
    %c0_i32_0 = arith.constant 0 : i32
    return %c0_i32, %arg0 : i32, i32
  }
  func.func @transform_3(%arg0: i32, %arg1: i32) -> (i32, i32) {
    %c0_i32 = arith.constant 0 : i32
    return %arg1, %arg0 : i32, i32
  }
}

</mosaic_0001>

<bundles_post_ra>
// kernel: fe_forward.2
= control target key start
LH: loop header
LB: loop body
LE: loop exit
PB: predicated region body
PF: predicated region fallthrough
CT: control target
= control target key end

     0   :  { %s916_s18 = smov 0   ;;  %s918_s19 = smov 0   ;;  %s1101_s0 = inlined_call_operand.vmem [shape: f32[2,128,64], index: 0, kind: input, shape index: {}]   ;;  %s1102_s1 = inlined_call_operand.vmem [shape: f32[4,128], index: 1, kind: input, shape index: {}]   ;;  %s1103_s2 = inlined_call_operand.vmem [shape: f32[4,1], index: 2, kind: input, shape index: {}]   ;;  %s1104_s3 = inlined_call_operand.vmem [shape: f32[64,9], index: 3, kind: input, shape index: {}]   ;;  %s1105_s4 = inlined_call_operand.vmem [shape: f32[2,4,9], index: 4, kind: output, shape index: {0}]   ;;  %s1106_s5 = inlined_call_operand.vmem [shape: f32[2,128,1], index: 5, kind: output, shape index: {1}]  }
   0x1   :  { %s920_s20 = smov 0  }
   0x2 LB: > { %s28_s21 = sadd.s32 1, %s876_s19  ;;  %p702_p0 = scmp.ge.s32.totalorder %s880_s20, 1  ;;  %s880_s20 = sphi %s920_s20, %s16_s20   ;;  %s876_s19 = sphi %s918_s19, %s1108_s19   ;;  %s872_s18 = sphi %s916_s18, %s1107_s18  }
   0x3   : > { %p30_p1 = scmp.ge.s32.totalorder %s28_s21, 2  ;;  %p220_p2 = scmp.lt.s32.totalorder %s880_s20, 3 }
   0x5   : > { %s1110_s21 = smov (%p30_p1, %s28_s21), 0  ;;  %p221_p3 = pnand %p702_p0, %p220_p2 }
   0x6   : > { %p265_p4 = scmp.lt.s32.totalorder (!%p221_p3), %s872_s18, 1  ;;  %v882_v0 = vmov (!%p221_p3), 0.0|0.0   ;;  %vm883_vm0 = vmmov (!%p221_p3), 0   ;;  %v884_v1 = vmov (!%p221_p3), 0.0   ;;  %v394_v2 = vld [vmem:[%s1103_s2] sm:$0xf] (!%p221_p3) }
   0x7   : > { %224 = sbr.rel (%p221_p3) target bundleno = 486 (0x1e6), region = 36  ;;  %793 = vmatprep.subr.bf16.mxu0 (!%p221_p3), %v882_v0  ;;  %771 = vmatprep.mubr.msk.f32.mxu0 (!%p221_p3), %vm883_vm0, %v884_v1  ;;  %v885_v3 = vmov (!%p221_p3), 0   ;;  %v481_v4 = vld [vmem:[%s1104_s3] sm:$0xff] (!%p221_p3)  ;;  %v482_v5 = vld [vmem:[%s1104_s3 + $0x8] sm:$0xff] (!%p221_p3)  ;;  %v483_v32 = vld [vmem:[%s1104_s3 + $0x10] sm:$0xff] (!%p221_p3)  ;;  %vm400_vm1 = vcmask (!%p221_p3), 519168  }
   0x8   : > { %857 = vset.pattern.permute.xlu0 (!%p221_p3), %v885_v3  ;;  %817 = vmatprep.subr.bf16.mxu1 (!%p221_p3), %v882_v0  ;;  %v818_v6 = vpack.c.bf16 (!%p221_p3), %v482_v5, %v481_v4  ;;  %v403_v31 = vld [vmem:[%s1102_s1] sm:$0xf] (!%p221_p3)  ;;  %v484_v33 = vld [vmem:[%s1104_s3 + $0x18] sm:$0xff] (!%p221_p3)  ;;  %v486_v36 = vld [vmem:[%s1104_s3 + $0x28] sm:$0xff] (!%p221_p3)  ;;  %vm308_vm2 = vcmask (!%p221_p3), 523264   ;;  %vm373_vm3 = vcmask (!%p221_p3), 7168  }
   0x9   : > { %397 = vperm.xlu0 (!%p221_p3), %857, %v394_v2   ;;  %790 = vmatprep.mubr.msk.f32.mxu1 (!%p221_p3), %vm883_vm0, %v884_v1  ;;  %v821_v34 = vpack.c.bf16 (!%p221_p3), %v484_v33, %v483_v32  ;;  %v485_v35 = vld [vmem:[%s1104_s3 + $0x20] sm:$0xff] (!%p221_p3)  ;;  %v487_v38 = vld [vmem:[%s1104_s3 + $0x30] sm:$0xff] (!%p221_p3)  ;;  %v488_v39 = vld [vmem:[%s1104_s3 + $0x38] sm:$0xff] (!%p221_p3)  ;;  %vm562_vm4 = vcmask (!%p221_p3), 68608  }
   0xa   : > { %819 = vmatpush3.bf16.msra.mxu1 (!%p221_p3), %v818_v6  ;;  %v824_v37 = vpack.c.bf16 (!%p221_p3), %v486_v36, %v485_v35  ;;  %v827_v40 = vpack.c.bf16 (!%p221_p3), %v488_v39, %v487_v38 }
   0xb   : > { %820 = vmatprep.subr.bf16.mxu1 (!%p221_p3), %v882_v0 }
   0xe   : > { %s1112_s18 = smov (!%p265_p4, %s872_s18), 1  ;;  %822 = vmatpush3.bf16.msra.mxu1 %v821_v34 }
   0xf   : > { %s711_s28 = sshll.u32 %s1112_s18, 7  ;;  %823 = vmatprep.subr.bf16.mxu1 %v882_v0 }
  0x10   : > { %s953_s6 = scalar_lea.vmem %s1101_s0, %s711_s28  ;;  %s1054_s27 = scalar_lea.vmem %s1106_s5, %s711_s28 }
  0x11   : > { %v956_v7 = vld [vmem:[%s953_s6] sm:$0xff]  ;;  %v293_v8 = vld [vmem:[%s953_s6 + $0x8] sm:$0xff]  ;;  %v294_v9 = vld [vmem:[%s953_s6 + $0x10] sm:$0xff]  ;;  %s705_s28 = sshll.u32 %s1112_s18, 2 }
  0x12   : > { %v794_v10 = vpack.c.bf16 %v293_v8, %v956_v7  ;;  %v962_v11 = vld [vmem:[%s953_s6 + $0x18] sm:$0xff]  ;;  %v296_v13 = vld [vmem:[%s953_s6 + $0x20] sm:$0xff]  ;;  %v969_v14 = vld [vmem:[%s953_s6 + $0x28] sm:$0xff]  ;;  %825 = vmatpush3.bf16.msra.mxu1 %v824_v37  ;;  %v312_v42 = vsel %vm308_vm2, %v293_v8, 0.0  ;;  %v315_v43 = vsel %vm308_vm2, %v294_v9, 0.0  ;;  %v309_v44 = vsel %vm308_vm2, %v956_v7, 0.0 }
  0x13   : > { %v797_v12 = vpack.c.bf16 %v962_v11, %v294_v9  ;;  %v800_v15 = vpack.c.bf16 %v969_v14, %v296_v13  ;;  %v974_v16 = vld [vmem:[%s953_s6 + $0x30] sm:$0xff]  ;;  %v977_v17 = vld [vmem:[%s953_s6 + $0x38] sm:$0xff]  ;;  %v983_v19 = vld [vmem:[%s953_s6 + $0x40] sm:$0xff]  ;;  %826 = vmatprep.subr.bf16.mxu1 %v882_v0  ;;  %313 = vadd.xlane.f32.xlu1 %v312_v42  ;;  %v318_v46 = vsel %vm308_vm2, %v962_v11, 0.0  ;;  %v321_v48 = vsel %vm308_vm2, %v296_v13, 0.0 }
  0x14   : > { %795 = vmatpush3.bf16.msra.mxu0 %v794_v10  ;;  %v803_v18 = vpack.c.bf16 %v977_v17, %v974_v16  ;;  %v986_v20 = vld [vmem:[%s953_s6 + $0x48] sm:$0xff]  ;;  %v302_v22 = vld [vmem:[%s953_s6 + $0x50] sm:$0xff]  ;;  %v303_v23 = vld [vmem:[%s953_s6 + $0x58] sm:$0xff]  ;;  %v324_v50 = vsel %vm308_vm2, %v969_v14, 0.0  ;;  %v327_v51 = vsel %vm308_vm2, %v974_v16, 0.0  ;;  %v330_v52 = vsel %vm308_vm2, %v977_v17, 0.0 }
  0x15   : > { %796 = vmatprep.subr.bf16.mxu0 %v882_v0  ;;  %v806_v21 = vpack.c.bf16 %v986_v20, %v983_v19  ;;  %v809_v24 = vpack.c.bf16 %v303_v23, %v302_v22  ;;  %v304_v25 = vld [vmem:[%s953_s6 + $0x60] sm:$0xff]  ;;  %v305_v26 = vld [vmem:[%s953_s6 + $0x68] sm:$0xff]  ;;  %v306_v28 = vld [vmem:[%s953_s6 + $0x70] sm:$0xff]  ;;  %v339_v45 = vsel %vm308_vm2, %v302_v22, 0.0  ;;  %v333_v53 = vsel %vm308_vm2, %v983_v19, 0.0 }
  0x16   : > { %v812_v27 = vpack.c.bf16 %v305_v26, %v304_v25  ;;  %v307_v29 = vld [vmem:[%s953_s6 + $0x78] sm:$0xff]  ;;  %828 = vmatpush3.bf16.msra.mxu1 %v827_v40  ;;  %v345_v47 = vsel %vm308_vm2, %v304_v25, 0.0  ;;  %v351_v49 = vsel %vm308_vm2, %v306_v28, 0.0  ;;  %v336_v54 = vsel %vm308_vm2, %v986_v20, 0.0  ;;  %s281_s6 = scalar_lea.vmem %s1105_s4, %s705_s28 }
  0x17   : > { %v815_v30 = vpack.c.bf16 %v307_v29, %v306_v28  ;;  %316 = vadd.xlane.f32.xlu1 %v315_v43  ;;  %v342_v55 = vsel %vm308_vm2, %v303_v23, 0.0  ;;  %v348_v56 = vsel %vm308_vm2, %v305_v26, 0.0  ;;  %v354_v57 = vsel %vm308_vm2, %v307_v29, 0.0 }
  0x18   : > { %798 = vmatpush3.bf16.msra.mxu0 %v797_v12 }
  0x19   : > { %799 = vmatprep.subr.bf16.mxu0 %v882_v0 }
  0x1b   : > { %319 = vadd.xlane.f32.xlu1 %v318_v46 }
  0x1c   : > { %801 = vmatpush3.bf16.msra.mxu0 %v800_v15 }
  0x1d   : > { %802 = vmatprep.subr.bf16.mxu0 %v882_v0 }
  0x1f   : > { %322 = vadd.xlane.f32.xlu1 %v321_v48 }
  0x20   : > { %804 = vmatpush3.bf16.msra.mxu0 %v803_v18 }
  0x21   : > { %805 = vmatprep.subr.bf16.mxu0 %v882_v0 }
  0x23   : > { %325 = vadd.xlane.f32.xlu1 %v324_v50 }
  0x24   : > { %807 = vmatpush3.bf16.msra.mxu0 %v806_v21 }
  0x25   : > { %808 = vmatprep.subr.bf16.mxu0 %v882_v0 }
  0x27   : > { %328 = vadd.xlane.f32.xlu1 %v327_v51 }
  0x28   : > { %810 = vmatpush3.bf16.msra.mxu0 %v809_v24  ;;  %310 = vadd.xlane.f32.xlu0 %v309_v44 }
  0x29   : > { %811 = vmatprep.subr.bf16.mxu0 %v882_v0 }
  0x2b   : > { %331 = vadd.xlane.f32.xlu1 %v330_v52 }
  0x2c   : > { %813 = vmatpush3.bf16.msra.mxu0 %v812_v27  ;;  %340 = vadd.xlane.f32.xlu0 %v339_v45 }
  0x2d   : > { %814 = vmatprep.subr.bf16.mxu0 %v882_v0 }
  0x2f   : > { %334 = vadd.xlane.f32.xlu1 %v333_v53 }
  0x30   : > { %816 = vmatpush3.bf16.msra.mxu0 %v815_v30  ;;  %346 = vadd.xlane.f32.xlu0 %v345_v47 }
  0x33   : > { %772 = vmatmul.mubr.f32.vlgmr.msra.gmra.mrb[0].mxu0 %v403_v31  ;;  %337 = vadd.xlane.f32.xlu1 %v336_v54 }
  0x34   : > { %352 = vadd.xlane.f32.xlu0 %v351_v49 }
  0x37   : > { %343 = vadd.xlane.f32.xlu1 %v342_v55 }
  0x3b   : > { %349 = vadd.xlane.f32.xlu1 %v348_v56 }
  0x3f   : > { %355 = vadd.xlane.f32.xlu1 %v354_v57 }
  0x88   : > { %v398_v41 = vpop.permute.xlu0 %397 }
  0x89   : > { %401 = vst.msk [vmem:[#allocation2] sm:$0xf] %vm400_vm1, %v398_v41 }
  0x90   : > { %v402_v58 = vld [vmem:[#allocation2] sm:$0xf] }
  0xa0   : > { %v314_v63 = vpop.xlane.xlu1 %313 }
  0xa1   : > { %v358_v0 = vmul.f32 0.015625, %v314_v63 }
  0xa3   : > { %375 = vst.msk [vmem:[%s1054_s27 + $0x8] sm:$0xff] %vm373_vm3, %v358_v0 }
  0xa4   : > { %v317_v3 = vpop.xlane.xlu1 %316 }
  0xa5   : > { %v359_v4 = vmul.f32 0.015625, %v317_v3 }
  0xa7   : > { %376 = vst.msk [vmem:[%s1054_s27 + $0x10] sm:$0xff] %vm373_vm3, %v359_v4 }
  0xa8   : > { %v320_v7 = vpop.xlane.xlu1 %319 }
  0xa9   : > { %v360_v8 = vmul.f32 0.015625, %v320_v7 }
  0xab   : > { %377 = vst.msk [vmem:[%s1054_s27 + $0x18] sm:$0xff] %vm373_vm3, %v360_v8 }
  0xac   : > { %v323_v11 = vpop.xlane.xlu1 %322 }
  0xad   : > { %v361_v12 = vmul.f32 0.015625, %v323_v11 }
  0xaf   : > { %378 = vst.msk [vmem:[%s1054_s27 + $0x20] sm:$0xff] %vm373_vm3, %v361_v12 }
  0xb0   : > { %v326_v15 = vpop.xlane.xlu1 %325 }
  0xb1   : > { %v362_v16 = vmul.f32 0.015625, %v326_v15 }
  0xb3   : > { %379 = vst.msk [vmem:[%s1054_s27 + $0x28] sm:$0xff] %vm373_vm3, %v362_v16 }
  0xb4   : > { %v329_v17 = vpop.xlane.xlu1 %328 }
  0xb5   : > { %v311_v1 = vpop.xlane.xlu0 %310  ;;  %v363_v18 = vmul.f32 0.015625, %v329_v17 }
  0xb6   : > { %v357_v2 = vmul.f32 0.015625, %v311_v1 }
  0xb7   : > { %380 = vst.msk [vmem:[%s1054_s27 + $0x30] sm:$0xff] %vm373_vm3, %v363_v18 }
  0xb8   : > { %374 = vst.msk [vmem:[%s1054_s27] sm:$0xff] %vm373_vm3, %v357_v2  ;;  %v332_v19 = vpop.xlane.xlu1 %331 }
  0xb9   : > { %v341_v5 = vpop.xlane.xlu0 %340  ;;  %v364_v20 = vmul.f32 0.015625, %v332_v19 }
  0xba   : > { %v367_v6 = vmul.f32 0.015625, %v341_v5 }
  0xbb   : > { %381 = vst.msk [vmem:[%s1054_s27 + $0x38] sm:$0xff] %vm373_vm3, %v364_v20 }
  0xbc   : > { %384 = vst.msk [vmem:[%s1054_s27 + $0x50] sm:$0xff] %vm373_vm3, %v367_v6  ;;  %v335_v21 = vpop.xlane.xlu1 %334 }
  0xbd   : > { %v347_v9 = vpop.xlane.xlu0 %346  ;;  %v365_v22 = vmul.f32 0.015625, %v335_v21 }
  0xbe   : > { %v369_v10 = vmul.f32 0.015625, %v347_v9 }
  0xbf   : > { %382 = vst.msk [vmem:[%s1054_s27 + $0x40] sm:$0xff] %vm373_vm3, %v365_v22 }
  0xc0   : > { %386 = vst.msk [vmem:[%s1054_s27 + $0x60] sm:$0xff] %vm373_vm3, %v369_v10  ;;  %v338_v23 = vpop.xlane.xlu1 %337 }
  0xc1   : > { %v353_v13 = vpop.xlane.xlu0 %352  ;;  %v366_v24 = vmul.f32 0.015625, %v338_v23 }
  0xc2   : > { %v371_v14 = vmul.f32 0.015625, %v353_v13 }
  0xc3   : > { %383 = vst.msk [vmem:[%s1054_s27 + $0x48] sm:$0xff] %vm373_vm3, %v366_v24 }
  0xc4   : > { %388 = vst.msk [vmem:[%s1054_s27 + $0x70] sm:$0xff] %vm373_vm3, %v371_v14  ;;  %v344_v25 = vpop.xlane.xlu1 %343 }
  0xc5   : > { %v368_v26 = vmul.f32 0.015625, %v344_v25 }
  0xc7   : > { %385 = vst.msk [vmem:[%s1054_s27 + $0x58] sm:$0xff] %vm373_vm3, %v368_v26 }
  0xc8   : > { %v350_v27 = vpop.xlane.xlu1 %349 }
  0xc9   : > { %v370_v28 = vmul.f32 0.015625, %v350_v27 }
  0xcb   : > { %387 = vst.msk [vmem:[%s1054_s27 + $0x68] sm:$0xff] %vm373_vm3, %v370_v28 }
  0xcc   : > { %v356_v29 = vpop.xlane.xlu1 %355 }
  0xcd   : > { %v372_v30 = vmul.f32 0.015625, %v356_v29 }
  0xcf   : > { %389 = vst.msk [vmem:[%s1054_s27 + $0x78] sm:$0xff] %vm373_vm3, %v372_v30 }
 0x106   : > { %v470_v59 = vpop.f32.mrb[0].mxu0 }
 0x107   : > { %v474_v60 = vadd.f32 %v470_v59, %v402_v58  ;;  %v773_v61 = vpop.f32.mrb[1].mxu0 }
 0x109   : > { %476 = vst.msk [vmem:[#allocation2] sm:$0xf] %vm400_vm1, %v474_v60 }
 0x110   : > { %v480_v62 = vld [vmem:[#allocation2] sm:$0xf] }
 0x111   : > { %791 = vmatmul.mubr.msk.f32.vlgmr.msra.gmra.mrb[0].mxu1 %vm308_vm2, %v480_v62 }
 0x1e4   : > { %v558_v31 = vpop.f32.mrb[0].mxu1 }
 0x1e5   : > { %563 = vst.msk [vmem:[%s281_s6] sm:$0xf] %vm562_vm4, %v558_v31  ;;  %v792_v32 = vpop.f32.mrb[1].mxu1 }
 0x1e6 PF: > { %s16_s20 = sadd.s32 1, %s880_s20   ;;  %s1107_s18 = smov %s876_s19 }
 0x1e7   : > { %p13_p5 = scmp.ge.s32.totalorder %s16_s20, 4   ;;  %s1108_s19 = smov %s1110_s21 }
 0x1e9   :  { %15 = sbr.rel (!%p13_p5) target bundleno = 2 (0x2), region = 89 }

// kernel: fe_forward.3
= control target key start
LH: loop header
LB: loop body
LE: loop exit
PB: predicated region body
PF: predicated region fallthrough
CT: control target
= control target key end

     0   :  { %s950_s12 = smov 0   ;;  %s952_s13 = smov 0   ;;  %s1131_s0 = inlined_call_operand.vmem [shape: f32[8,2048], index: 0, kind: input, shape index: {}]   ;;  %s1132_s1 = inlined_call_operand.vmem [shape: f32[8,32], index: 1, kind: input, shape index: {}]   ;;  %s1133_s2 = inlined_call_operand.vmem [shape: f32[32,2048], index: 2, kind: input, shape index: {}]   ;;  %s1134_s3 = inlined_call_operand.vmem [shape: f32[8,2048], index: 3, kind: output, shape index: {}]  }
   0x1   :  { %s954_s14 = smov 0   ;;  %s956_s15 = smov 0  }
   0x2   :  { %s958_s16 = smov 0  }
   0x3 LB: > { %s25_s17 = sadd.s32 1, %s923_s15  ;;  %p93_p1 = scmp.ne.s32.totalorder %s915_s13, %s911_s12  ;;  %s927_s16 = sphi %s958_s16, %s13_s16   ;;  %s923_s15 = sphi %s956_s15, %s1138_s15   ;;  %s919_s14 = sphi %s954_s14, %s1137_s14   ;;  %s915_s13 = sphi %s952_s13, %s1136_s13   ;;  %s911_s12 = sphi %s950_s12, %s1135_s12  }
   0x4   : > { %p27_p0 = scmp.ge.s32.totalorder %s25_s17, 2  ;;  %p94_p2 = scmp.eq.s32.totalorder %s927_s16, 0 }
   0x5   : > { %s86_s19 = sadd.s32 1, %s915_s13  ;;  %p799_p5 = scmp.ge.s32.totalorder %s927_s16, 2 }
   0x6   : > { %s1140_s17 = smov (%p27_p0, %s25_s17), 0  ;;  %p95_p3 = por %p94_p2, %p93_p1 }
   0x7   : > { %s83_s18 = ssub.s32 %s923_s15, %s1140_s17  ;;  %154 = sbr.rel (%p799_p5) target bundleno = 34 (0x22), region = 20 }
   0x8   : > { %p84_p4 = scmp.eq.s32.totalorder %s83_s18, 0 }
   0xa   : > { %s985_s20 = scalar_select %p84_p4, %s915_s13, %s86_s19  }
   0xe   : > { %170 = sbr.rel (!%p95_p3) target bundleno = 34 (0x22), region = 28  ;;  %s172_s21 = sand.u32 (%p95_p3), 1, %s915_s13  }
   0xf   : > { %s815_s22 = sshll.u32 (%p95_p3), %s923_s15, 6  ;;  %s800_s23 = sshll.u32 (%p95_p3), %s172_s21, 8 }
  0x10   : > { %s993_s26 = scalar_lea.vmem (%p95_p3), %s1133_s2, %s815_s22  ;;  %s998_s27 = scalar_lea.vmem (%p95_p3), [#allocation2], %s800_s23 }
  0x11   : > { %v190_v0 = vld [vmem:[%s993_s26] sm:$0xff] (%p95_p3)  ;;  %v192_v1 = vld [vmem:[%s993_s26 + $0x8] sm:$0xff] (%p95_p3)  ;;  %v194_v2 = vld [vmem:[%s993_s26 + $0x10] sm:$0xff] (%p95_p3) }
  0x12   : > { %191 = vst [vmem:[%s998_s27] sm:$0xff] (%p95_p3), %v190_v0  ;;  %193 = vst [vmem:[%s998_s27 + $0x8] sm:$0xff] (%p95_p3), %v192_v1  ;;  %v196_v3 = vld [vmem:[%s993_s26 + $0x18] sm:$0xff] (%p95_p3)  ;;  %v198_v4 = vld [vmem:[%s993_s26 + $0x20] sm:$0xff] (%p95_p3) }
  0x13   : > { %195 = vst [vmem:[%s998_s27 + $0x10] sm:$0xff] (%p95_p3), %v194_v2  ;;  %v200_v5 = vld [vmem:[%s993_s26 + $0x28] sm:$0xff] (%p95_p3)  ;;  %197 = vst [vmem:[%s998_s27 + $0x18] sm:$0xff] (%p95_p3), %v196_v3  ;;  %v202_v6 = vld [vmem:[%s993_s26 + $0x30] sm:$0xff] (%p95_p3) }
  0x14   : > { %199 = vst [vmem:[%s998_s27 + $0x20] sm:$0xff] (%p95_p3), %v198_v4  ;;  %201 = vst [vmem:[%s998_s27 + $0x28] sm:$0xff] (%p95_p3), %v200_v5  ;;  %v204_v7 = vld [vmem:[%s993_s26 + $0x38] sm:$0xff] (%p95_p3)  ;;  %v206_v8 = vld [vmem:[%s993_s26 + $0x80] sm:$0xff] (%p95_p3) }
  0x15   : > { %203 = vst [vmem:[%s998_s27 + $0x30] sm:$0xff] %v202_v6  ;;  %205 = vst [vmem:[%s998_s27 + $0x38] sm:$0xff] %v204_v7  ;;  %v208_v9 = vld [vmem:[%s993_s26 + $0x88] sm:$0xff]  ;;  %v210_v10 = vld [vmem:[%s993_s26 + $0x90] sm:$0xff] }
  0x16   : > { %207 = vst [vmem:[%s998_s27 + $0x40] sm:$0xff] %v206_v8  ;;  %v212_v11 = vld [vmem:[%s993_s26 + $0x98] sm:$0xff]  ;;  %209 = vst [vmem:[%s998_s27 + $0x48] sm:$0xff] %v208_v9  ;;  %v214_v12 = vld [vmem:[%s993_s26 + $0xa0] sm:$0xff] }
  0x17   : > { %211 = vst [vmem:[%s998_s27 + $0x50] sm:$0xff] %v210_v10  ;;  %213 = vst [vmem:[%s998_s27 + $0x58] sm:$0xff] %v212_v11  ;;  %v216_v13 = vld [vmem:[%s993_s26 + $0xa8] sm:$0xff]  ;;  %v218_v14 = vld [vmem:[%s993_s26 + $0xb0] sm:$0xff] }
  0x18   : > { %215 = vst [vmem:[%s998_s27 + $0x60] sm:$0xff] %v214_v12  ;;  %217 = vst [vmem:[%s998_s27 + $0x68] sm:$0xff] %v216_v13  ;;  %v220_v15 = vld [vmem:[%s993_s26 + $0xb8] sm:$0xff]  ;;  %v222_v16 = vld [vmem:[%s993_s26 + $0x100] sm:$0xff] }
  0x19   : > { %219 = vst [vmem:[%s998_s27 + $0x70] sm:$0xff] %v218_v14  ;;  %v224_v17 = vld [vmem:[%s993_s26 + $0x108] sm:$0xff]  ;;  %221 = vst [vmem:[%s998_s27 + $0x78] sm:$0xff] %v220_v15  ;;  %v226_v18 = vld [vmem:[%s993_s26 + $0x110] sm:$0xff] }
  0x1a   : > { %223 = vst [vmem:[%s998_s27 + $0x80] sm:$0xff] %v222_v16  ;;  %225 = vst [vmem:[%s998_s27 + $0x88] sm:$0xff] %v224_v17  ;;  %v228_v19 = vld [vmem:[%s993_s26 + $0x118] sm:$0xff]  ;;  %v230_v20 = vld [vmem:[%s993_s26 + $0x120] sm:$0xff] }
  0x1b   : > { %227 = vst [vmem:[%s998_s27 + $0x90] sm:$0xff] %v226_v18  ;;  %229 = vst [vmem:[%s998_s27 + $0x98] sm:$0xff] %v228_v19  ;;  %v232_v21 = vld [vmem:[%s993_s26 + $0x128] sm:$0xff]  ;;  %v234_v22 = vld [vmem:[%s993_s26 + $0x130] sm:$0xff] }
  0x1c   : > { %231 = vst [vmem:[%s998_s27 + $0xa0] sm:$0xff] %v230_v20  ;;  %v236_v23 = vld [vmem:[%s993_s26 + $0x138] sm:$0xff]  ;;  %233 = vst [vmem:[%s998_s27 + $0xa8] sm:$0xff] %v232_v21  ;;  %v238_v24 = vld [vmem:[%s993_s26 + $0x180] sm:$0xff] }
  0x1d   : > { %235 = vst [vmem:[%s998_s27 + $0xb0] sm:$0xff] %v234_v22  ;;  %237 = vst [vmem:[%s998_s27 + $0xb8] sm:$0xff] %v236_v23  ;;  %v240_v25 = vld [vmem:[%s993_s26 + $0x188] sm:$0xff]  ;;  %v242_v26 = vld [vmem:[%s993_s26 + $0x190] sm:$0xff] }
  0x1e   : > { %239 = vst [vmem:[%s998_s27 + $0xc0] sm:$0xff] %v238_v24  ;;  %241 = vst [vmem:[%s998_s27 + $0xc8] sm:$0xff] %v240_v25  ;;  %v244_v27 = vld [vmem:[%s993_s26 + $0x198] sm:$0xff]  ;;  %v246_v28 = vld [vmem:[%s993_s26 + $0x1a0] sm:$0xff] }
  0x1f   : > { %243 = vst [vmem:[%s998_s27 + $0xd0] sm:$0xff] %v242_v26  ;;  %v248_v29 = vld [vmem:[%s993_s26 + $0x1a8] sm:$0xff]  ;;  %245 = vst [vmem:[%s998_s27 + $0xd8] sm:$0xff] %v244_v27  ;;  %v250_v30 = vld [vmem:[%s993_s26 + $0x1b0] sm:$0xff] }
  0x20   : > { %247 = vst [vmem:[%s998_s27 + $0xe0] sm:$0xff] %v246_v28  ;;  %249 = vst [vmem:[%s998_s27 + $0xe8] sm:$0xff] %v248_v29  ;;  %v252_v31 = vld [vmem:[%s993_s26 + $0x1b8] sm:$0xff] }
  0x21   : > { %251 = vst [vmem:[%s998_s27 + $0xf0] sm:$0xff] %v250_v30  ;;  %253 = vst [vmem:[%s998_s27 + $0xf8] sm:$0xff] %v252_v31 }
  0x22 PF: > { %p803_p6 = scmp.ge.s32.totalorder %s927_s16, 1  ;;  %p258_p7 = scmp.lt.s32.totalorder %s927_s16, 3 }
  0x24   : > { %p259_p8 = pnand %p803_p6, %p258_p7 }
  0x25   : > { %s265_s28 = sand.u32 (!%p259_p8), 1, %s911_s12   ;;  %v929_v32 = vmov (!%p259_p8), 0.0   ;;  %v330_v59 = vld [vmem:[%s1132_s1] sm:$0xff] (!%p259_p8)  ;;  %vm363_vm0 = vcmask (!%p259_p8), 261120   ;;  %s805_s6 = sshll.u32 (!%p259_p8), %s919_s14, 3 }
  0x26   : > { %262 = sbr.rel (%p259_p8) target bundleno = 277 (0x115), region = 51  ;;  %s804_s29 = sshll.u32 (!%p259_p8), %s265_s28, 8  ;;  %431 = vmatprep.mubr.f32.mxu0 (!%p259_p8), %v929_v32  ;;  %502 = vmatprep.mubr.f32.mxu1 (!%p259_p8), %v929_v32 }
  0x27   : > { %s1066_s30 = scalar_lea.vmem (!%p259_p8), [#allocation2], %s804_s29  ;;  %p308_p9 = scmp.lt.s32.totalorder (!%p259_p8), %s805_s6, 15 }
  0x28   : > { %v332_v33 = vld [vmem:[%s1066_s30 + $0x8] sm:$0xff] (!%p259_p8)  ;;  %v334_v35 = vld [vmem:[%s1066_s30 + $0x18] sm:$0xff] (!%p259_p8)  ;;  %v331_v38 = vld [vmem:[%s1066_s30] sm:$0xff] (!%p259_p8) }
  0x29   : > { %v340_v34 = vld [vmem:[%s1066_s30 + $0x48] sm:$0xff] (!%p259_p8)  ;;  %v342_v37 = vld [vmem:[%s1066_s30 + $0x58] sm:$0xff] (!%p259_p8)  ;;  %v339_v39 = vld [vmem:[%s1066_s30 + $0x40] sm:$0xff] (!%p259_p8) }
  0x2a   : > { %v816_v36 = vpack.c.bf16 (!%p259_p8), %v340_v34, %v332_v33  ;;  %v824_v40 = vpack.c.bf16 (!%p259_p8), %v342_v37, %v334_v35  ;;  %v818_v41 = vpack.c.bf16 (!%p259_p8), %v339_v39, %v331_v38  ;;  %v333_v42 = vld [vmem:[%s1066_s30 + $0x10] sm:$0xff] (!%p259_p8)  ;;  %v348_v44 = vld [vmem:[%s1066_s30 + $0x88] sm:$0xff] (!%p259_p8)  ;;  %v350_v47 = vld [vmem:[%s1066_s30 + $0x98] sm:$0xff] (!%p259_p8) }
  0x2b   : > { %v341_v43 = vld [vmem:[%s1066_s30 + $0x50] sm:$0xff] (!%p259_p8)  ;;  %v356_v46 = vld [vmem:[%s1066_s30 + $0xc8] sm:$0xff] (!%p259_p8)  ;;  %v358_v48 = vld [vmem:[%s1066_s30 + $0xd8] sm:$0xff] (!%p259_p8) }
  0x2c   : > { %817 = vmatprep.subr.bf16.mxu0 (!%p259_p8), %v816_v36  ;;  %v826_v45 = vpack.c.bf16 (!%p259_p8), %v341_v43, %v333_v42  ;;  %825 = vmatprep.subr.bf16.mxu1 (!%p259_p8), %v824_v40  ;;  %v820_v49 = vpack.c.bf16 (!%p259_p8), %v356_v46, %v348_v44  ;;  %v828_v50 = vpack.c.bf16 (!%p259_p8), %v358_v48, %v350_v47  ;;  %v347_v51 = vld [vmem:[%s1066_s30 + $0x80] sm:$0xff] (!%p259_p8)  ;;  %v349_v53 = vld [vmem:[%s1066_s30 + $0x90] sm:$0xff] (!%p259_p8)  ;;  %v336_v56 = vld [vmem:[%s1066_s30 + $0x28] sm:$0xff] (!%p259_p8) }
  0x2d   : > { %819 = vmatpush1.bf16.msra.mxu0 %v818_v41  ;;  %v355_v52 = vld [vmem:[%s1066_s30 + $0xc0] sm:$0xff]  ;;  %v357_v55 = vld [vmem:[%s1066_s30 + $0xd0] sm:$0xff]  ;;  %v344_v57 = vld [vmem:[%s1066_s30 + $0x68] sm:$0xff]  ;;  %s1142_s6 = smov (!%p308_p9, %s805_s6), 15 }
  0x2e   : > { %827 = vmatpush1.bf16.msra.mxu1 %v826_v45  ;;  %v822_v54 = vpack.c.bf16 %v355_v52, %v347_v51  ;;  %821 = vmatprep.subr.bf16.mxu0 %v820_v49  ;;  %v830_v58 = vpack.c.bf16 %v357_v55, %v349_v53  ;;  %v832_v60 = vpack.c.bf16 %v344_v57, %v336_v56  ;;  %v338_v61 = vld [vmem:[%s1066_s30 + $0x38] sm:$0xff]  ;;  %v335_v63 = vld [vmem:[%s1066_s30 + $0x20] sm:$0xff]  ;;  %v337_v2 = vld [vmem:[%s1066_s30 + $0x30] sm:$0xff]  ;;  %s806_s7 = sshll.u32 %s1142_s6, 3 }
  0x2f   : > { %829 = vmatprep.subr.bf16.mxu1 %v828_v50  ;;  %v346_v62 = vld [vmem:[%s1066_s30 + $0x78] sm:$0xff]  ;;  %v343_v1 = vld [vmem:[%s1066_s30 + $0x60] sm:$0xff]  ;;  %v345_v3 = vld [vmem:[%s1066_s30 + $0x70] sm:$0xff]  ;;  %s313_s10 = scalar_lea.vmem %s1131_s0, %s806_s7  ;;  %s328_s18 = scalar_lea.vmem %s1134_s3, %s806_s7 }
  0x30   : > { %v840_v0 = vpack.c.bf16 %v346_v62, %v338_v61  ;;  %v834_v4 = vpack.c.bf16 %v343_v1, %v335_v63  ;;  %v352_v5 = vld [vmem:[%s1066_s30 + $0xa8] sm:$0xff]  ;;  %v354_v7 = vld [vmem:[%s1066_s30 + $0xb8] sm:$0xff]  ;;  %v842_v8 = vpack.c.bf16 %v345_v3, %v337_v2  ;;  %v351_v11 = vld [vmem:[%s1066_s30 + $0xa0] sm:$0xff] }
  0x31   : > { %823 = vmatpush1.bf16.msra.mxu0 %v822_v54  ;;  %v360_v6 = vld [vmem:[%s1066_s30 + $0xe8] sm:$0xff]  ;;  %v362_v10 = vld [vmem:[%s1066_s30 + $0xf8] sm:$0xff]  ;;  %v359_v12 = vld [vmem:[%s1066_s30 + $0xe0] sm:$0xff] }
  0x32   : > { %831 = vmatpush1.bf16.msra.mxu1 %v830_v58  ;;  %833 = vmatprep.subr.bf16.mxu0 %v832_v60  ;;  %v836_v9 = vpack.c.bf16 %v360_v6, %v352_v5  ;;  %v844_v13 = vpack.c.bf16 %v362_v10, %v354_v7  ;;  %v353_v14 = vld [vmem:[%s1066_s30 + $0xb0] sm:$0xff]  ;;  %v838_v16 = vpack.c.bf16 %v359_v12, %v351_v11  ;;  %v651_v18 = vld [vmem:[%s313_s10] sm:$0xff]  ;;  %v652_v20 = vld [vmem:[%s313_s10 + $0x8] sm:$0xff] }
  0x33   : > { %841 = vmatprep.subr.bf16.mxu1 %v840_v0  ;;  %v361_v15 = vld [vmem:[%s1066_s30 + $0xf0] sm:$0xff]  ;;  %v654_v22 = vld [vmem:[%s313_s10 + $0x18] sm:$0xff]  ;;  %v655_v30 = vld [vmem:[%s313_s10 + $0x20] sm:$0xff] }
  0x34   : > { %809 = vmatmul.mubr.msk.f32.vlgmr.msra.gmra.mrb[0].mxu0 %vm363_vm0, %v330_v59  ;;  %v846_v17 = vpack.c.bf16 %v361_v15, %v353_v14  ;;  %v653_v19 = vld [vmem:[%s313_s10 + $0x10] sm:$0xff]  ;;  %v658_v34 = vld [vmem:[%s313_s10 + $0x38] sm:$0xff] }
  0x35   : > { %810 = vmatmul.mubr.msk.f32.vlgmr.msra.gmra.mrb[0].mxu1 %vm363_vm0, %v330_v59  ;;  %835 = vmatpush1.bf16.msra.mxu0 %v834_v4  ;;  %v657_v31 = vld [vmem:[%s313_s10 + $0x30] sm:$0xff] }
  0x36   : > { %843 = vmatpush1.bf16.msra.mxu1 %v842_v8  ;;  %837 = vmatprep.subr.bf16.mxu0 %v836_v9 }
  0x37   : > { %845 = vmatprep.subr.bf16.mxu1 %v844_v13  ;;  %573 = vmatprep.mubr.f32.mxu0 %v929_v32 }
  0x38   : > { %644 = vmatprep.mubr.f32.mxu1 %v929_v32  ;;  %v656_v32 = vld [vmem:[%s313_s10 + $0x28] sm:$0xff] }
  0x39   : > { %839 = vmatpush1.bf16.msra.mxu0 %v838_v16 }
  0x3a   : > { %847 = vmatpush1.bf16.msra.mxu1 %v846_v17 }
  0x3c   : > { %811 = vmatmul.mubr.msk.f32.vlgmr.msra.gmra.mrb[2].mxu0 %vm363_vm0, %v330_v59 }
  0x3d   : > { %812 = vmatmul.mubr.msk.f32.vlgmr.msra.gmra.mrb[2].mxu1 %vm363_vm0, %v330_v59 }
 0x107   : > { %v433_v21 = vpop.f32.mrb[0].mxu0 }
 0x108   : > { %v659_v23 = vmul.f32 %v651_v18, %v433_v21  ;;  %v504_v24 = vpop.f32.mrb[0].mxu1  ;;  %v435_v25 = vpop.f32.mrb[1].mxu0 }
 0x109   : > { %v661_v26 = vmul.f32 %v653_v19, %v504_v24  ;;  %v660_v27 = vmul.f32 %v652_v20, %v435_v25  ;;  %v506_v28 = vpop.f32.mrb[1].mxu1 }
 0x10a   : > { %667 = vst [vmem:[%s328_s18] sm:$0xff] %v659_v23  ;;  %v662_v29 = vmul.f32 %v654_v22, %v506_v28 }
 0x10b   : > { %669 = vst [vmem:[%s328_s18 + $0x10] sm:$0xff] %v661_v26  ;;  %668 = vst [vmem:[%s328_s18 + $0x8] sm:$0xff] %v660_v27 }
 0x10c   : > { %670 = vst [vmem:[%s328_s18 + $0x18] sm:$0xff] %v662_v29 }
 0x10f   : > { %v575_v33 = vpop.f32.mrb[2].mxu0 }
 0x110   : > { %v663_v35 = vmul.f32 %v655_v30, %v575_v33  ;;  %v646_v36 = vpop.f32.mrb[2].mxu1  ;;  %v577_v37 = vpop.f32.mrb[3].mxu0 }
 0x111   : > { %v665_v38 = vmul.f32 %v657_v31, %v646_v36  ;;  %v664_v39 = vmul.f32 %v656_v32, %v577_v37  ;;  %v648_v40 = vpop.f32.mrb[3].mxu1 }
 0x112   : > { %671 = vst [vmem:[%s328_s18 + $0x20] sm:$0xff] %v663_v35  ;;  %v666_v41 = vmul.f32 %v658_v34, %v648_v40 }
 0x113   : > { %673 = vst [vmem:[%s328_s18 + $0x30] sm:$0xff] %v665_v38  ;;  %672 = vst [vmem:[%s328_s18 + $0x28] sm:$0xff] %v664_v39 }
 0x114   : > { %674 = vst [vmem:[%s328_s18 + $0x38] sm:$0xff] %v666_v41 }
 0x115 PF: > { %s13_s16 = sadd.s32 1, %s927_s16   ;;  %s1135_s12 = smov %s915_s13 }
 0x116   : > { %p10_p10 = scmp.ge.s32.totalorder %s13_s16, 4   ;;  %s1136_s13 = smov %s985_s20 }
 0x117   : > { %s1137_s14 = smov %s923_s15  ;;  %s1138_s15 = smov %s1140_s17 }
 0x118   :  { %12 = sbr.rel (!%p10_p10) target bundleno = 3 (0x3), region = 96 }

</bundles_post_ra>
